<compile_context>
chip_gen: v7x
topology: tpu7x:2x2x1
jax: 0.10.0
libtpu: 0.0.40
codegen_flags: <defaults>
</compile_context>

<pallas_src>
import jax
import jax.numpy as jnp
import numpy as np
from jax.experimental import pallas as pl
from jax.experimental.pallas import tpu as pltpu


def _text_fm_kernel(idxT_ref, xtT_ref, tableT_ref, wtxtT_ref, btxtT_ref, out_ref):
    num_fields, tile_b = idxT_ref.shape
    two_e_plus_1, total = tableT_ref.shape
    embed_dim = (two_e_plus_1 - 1) // 2
    cdt = tableT_ref.dtype

    idxT = idxT_ref[...]                                           # (F, TB) int32
    col = jax.lax.broadcasted_iota(jnp.int32, (total, 1), 0)       # (total, 1)

    # Multi-hot over fields (offset-disjoint -> one 1 per field per column).
    multihot = (col == idxT[0:1, :]).astype(cdt)                   # (total, TB)
    for f in range(1, num_fields):                                 # static, tiny F
        multihot = multihot + (col == idxT[f:f + 1, :]).astype(cdt)

    # One MXU call: rows [0:E) = sum_f emb, [E:2E) = sum_f emb^2, [2E] = first order.
    g = jnp.dot(tableT_ref[...], multihot,
                preferred_element_type=jnp.float32)                # (2E+1, TB) f32

    # Fused text projections: blockdiag(w1,w2)^T @ [user_text ; book_text]^T + b.
    txt = jnp.dot(wtxtT_ref[...], xtT_ref[...],
                  preferred_element_type=jnp.float32) + btxtT_ref[...]   # (2E, TB)
    ut = txt[:embed_dim, :]
    it = txt[embed_dim:, :]

    # FM second order on the virtual field concat [ub_emb, ut, it].
    s = g[:embed_dim, :] + ut + it                                 # (E, TB)
    ss = g[embed_dim:2 * embed_dim, :] + ut * ut + it * it         # (E, TB)
    second = 0.5 * jnp.sum(s * s - ss, axis=0, keepdims=True)      # (1, TB)

    out_ref[...] = (g[2 * embed_dim:, :] + second).astype(out_ref.dtype)


def text_fm_forward(user_book, user_text, book_text, params, *, tile_b=1024,
                    use_bf16=False):
    """Forward pass.  tile_b must be a multiple of 128 (lane-dense output)."""
    emb_table, fc_table, fc_bias, w1, b1, w2, b2, offsets = params

    B, num_fields = user_book.shape
    word_dim, embed_dim = w1.shape
    total = emb_table.shape[0]
    assert tile_b % 128 == 0

    # bf16 multihot/inputs are exact; bf16 table rounds embedding values (doc'd).
    compute_dtype = jnp.bfloat16 if use_bf16 else jnp.float32
    itemsize = jnp.dtype(compute_dtype).itemsize

    # ---- wrapper-side prep (layout plumbing only; no large HBM intermediates) --
    idx_T = (user_book + offsets[None, :]).astype(jnp.int32).T          # (F, B)
    xtT = jnp.concatenate([user_text.astype(compute_dtype).T,
                           book_text.astype(compute_dtype).T], axis=0)  # (2W, B)

    emb = emb_table.astype(jnp.float32)
    table_T = jnp.concatenate(
        [emb.T, (emb * emb).T, fc_table.astype(jnp.float32).T],
        axis=0).astype(compute_dtype)                                   # (2E+1, total)

    zerosT = jnp.zeros((embed_dim, word_dim), jnp.float32)
    w_txt_T = jnp.concatenate(
        [jnp.concatenate([w1.T, zerosT], axis=1),
         jnp.concatenate([zerosT, w2.T], axis=1)],
        axis=0).astype(compute_dtype)                                   # (2E, 2W)
    b_txt_T = jnp.concatenate(
        [b1.reshape(embed_dim, 1), b2.reshape(embed_dim, 1)],
        axis=0).astype(jnp.float32)                                     # (2E, 1)

    # ---- pad batch to a multiple of tile_b (index 0 padding is harmless) -------
    num_tiles = pl.cdiv(B, tile_b)
    b_pad = num_tiles * tile_b
    pad = b_pad - B
    if pad:
        idx_T = jnp.pad(idx_T, ((0, 0), (0, pad)))
        xtT = jnp.pad(xtT, ((0, 0), (0, pad)))

    # ---- explicit VMEM budget (double-buffered streams + resident weights) -----
    resident = ((2 * embed_dim + 1) * total * itemsize
                + (2 * embed_dim) * (2 * word_dim) * itemsize
                + (2 * embed_dim) * 4)
    streamed = (num_fields * tile_b * 4
                + (2 * word_dim) * tile_b * itemsize
                + tile_b * 4)
    scratch = (total * tile_b * itemsize                 # multihot intermediate
               + (2 * embed_dim + 1) * tile_b * 4        # g
               + 8 * embed_dim * tile_b * 4)             # txt / s / ss temporaries
    needed = 2 * (resident + streamed) + 2 * scratch
    vmem_limit = int(min(max(needed, 32 * 1024 * 1024), 64 * 1024 * 1024))

    out = pl.pallas_call(
        _text_fm_kernel,
        out_shape=jax.ShapeDtypeStruct((1, b_pad), jnp.float32),
        grid=(num_tiles,),
        in_specs=[
            # batch-tiled streams (feature-major, lane = batch)
            pl.BlockSpec((num_fields, tile_b), lambda i: (0, i)),
            pl.BlockSpec((2 * word_dim, tile_b), lambda i: (0, i)),
            # resident weights (same block every grid step)
            pl.BlockSpec((2 * embed_dim + 1, total), lambda i: (0, 0)),
            pl.BlockSpec((2 * embed_dim, 2 * word_dim), lambda i: (0, 0)),
            pl.BlockSpec((2 * embed_dim, 1), lambda i: (0, 0)),
        ],
        out_specs=pl.BlockSpec((1, tile_b), lambda i: (0, i)),
        compiler_params=pltpu.CompilerParams(
            dimension_semantics=("parallel",),            # megacore split (v7x)
            vmem_limit_bytes=vmem_limit),
    )(idx_T, xtT, table_T, w_txt_T, b_txt_T)

    # fc_bias folded in here (review: drop the (1,1) kernel input).
    return out[0, :B] + fc_bias.reshape(()).astype(jnp.float32)         # (B,)


def reference_forward(user_book, user_text, book_text, params):
    """Pure-JAX reference mirroring the PyTorch module exactly."""
    emb_table, fc_table, fc_bias, w1, b1, w2, b2, offsets = params
    idx = user_book + offsets[None, :]
    first_order = jnp.sum(fc_table[idx], axis=1) + fc_bias[None, :]      # (B, 1)
    ub_emb = emb_table[idx]                                              # (B, F, E)
    ut = (user_text @ w1 + b1)[:, None, :]                               # (B, 1, E)
    it = (book_text @ w2 + b2)[:, None, :]                               # (B, 1, E)
    dense = jnp.concatenate([ub_emb, ut, it], axis=1)                    # (B, F+2, E)
    sq_of_sum = jnp.sum(dense, axis=1) ** 2
    sum_of_sq = jnp.sum(dense ** 2, axis=1)
    second_order = 0.5 * jnp.sum(sq_of_sum - sum_of_sq, axis=1)          # (B,)
    return first_order[:, 0] + second_order


if __name__ == "__main__":
    # Small deterministic config.  tile_b=128 keeps the test tiny while still
    # exercising a multi-step grid (B=300 -> padded 384 -> grid=(3,)).
    B = 300
    field_dims = (10, 20)          # e.g. (num_users, num_books)
    embed_dim = 16
    word_dim = 32

    key = jax.random.PRNGKey(0)
    keys = jax.random.split(key, 10)

    total = int(np.sum(field_dims))
    offsets = jnp.asarray(np.r_[0, np.cumsum(field_dims)[:-1]], dtype=jnp.int32)

    emb_table = jax.random.normal(keys[0], (total, embed_dim), jnp.float32) * 0.1
    fc_table = jax.random.normal(keys[1], (total, 1), jnp.float32) * 0.1
    fc_bias = jax.random.normal(keys[2], (1,), jnp.float32) * 0.1
    w1 = jax.random.normal(keys[3], (word_dim, embed_dim), jnp.float32) * 0.1
    b1 = jax.random.normal(keys[4], (1, embed_dim), jnp.float32) * 0.1
    w2 = jax.random.normal(keys[5], (word_dim, embed_dim), jnp.float32) * 0.1
    b2 = jax.random.normal(keys[6], (1, embed_dim), jnp.float32) * 0.1
    params = (emb_table, fc_table, fc_bias, w1, b1, w2, b2, offsets)

    user_book = jnp.stack(
        [jax.random.randint(keys[7], (B,), 0, field_dims[0]),
         jax.random.randint(keys[8], (B,), 0, field_dims[1])],
        axis=1).astype(jnp.int32)                                        # (B, F)
    user_text = jax.random.normal(keys[9], (B, word_dim), jnp.float32)
    book_text = jax.random.normal(jax.random.PRNGKey(123), (B, word_dim),
                                  jnp.float32)

    out = text_fm_forward(user_book, user_text, book_text, params, tile_b=128)
    out = jax.block_until_ready(out)

    ref = jax.block_until_ready(
        reference_forward(user_book, user_text, book_text, params))
    assert out.shape == (B,)
    assert np.allclose(np.asarray(out), np.asarray(ref), atol=1e-4, rtol=1e-4)

    print("KERNEL_OK")
</pallas_src>

<mosaic_0001>
module attributes {stable_mosaic.version = 11 : i64} {
  func.func @_text_fm_kernel(%arg0: i32, %arg1: memref<2x128xi32, #tpu.memory_space<vmem>>, %arg2: memref<64x128xf32, #tpu.memory_space<vmem>>, %arg3: memref<33x30xf32, #tpu.memory_space<vmem>>, %arg4: memref<32x64xf32, #tpu.memory_space<vmem>>, %arg5: memref<32x1xf32, #tpu.memory_space<vmem>>, %arg6: memref<1x128xf32, #tpu.memory_space<vmem>>) attributes {dimension_semantics = [#tpu.dimension_semantics<parallel>], iteration_bounds = array<i64: 3>, scalar_prefetch = 0 : i64, scratch_operands = 0 : i64, tpu.core_type = #tpu.core_type<tc>, window_params = [{transform_indices = @transform_0, window_bounds = array<i64: 2, 128>}, {transform_indices = @transform_1, window_bounds = array<i64: 64, 128>}, {pipeline_mode = #tpu.pipeline_mode<synchronous>, transform_indices = @transform_2, window_bounds = array<i64: 33, 30>}, {pipeline_mode = #tpu.pipeline_mode<synchronous>, transform_indices = @transform_3, window_bounds = array<i64: 32, 64>}, {pipeline_mode = #tpu.pipeline_mode<synchronous>, transform_indices = @transform_4, window_bounds = array<i64: 32, 1>}, {transform_indices = @transform_5, window_bounds = array<i64: 1, 128>}]} {
    %c0 = arith.constant 0 : index
    %c0_0 = arith.constant 0 : index
    %0 = vector.load %arg1[%c0, %c0_0] : memref<2x128xi32, #tpu.memory_space<vmem>>, vector<2x128xi32>
    %1 = tpu.iota {dimensions = array<i32: 0>} : vector<30x1xi32>
    %2 = vector.extract_strided_slice %0 {offsets = [0, 0], sizes = [1, 128], strides = [1, 1]} : vector<2x128xi32> to vector<1x128xi32>
    %3 = vector.broadcast %1 : vector<30x1xi32> to vector<30x128xi32>
    %4 = vector.broadcast %2 : vector<1x128xi32> to vector<30x128xi32>
    %5 = arith.cmpi eq, %3, %4 : vector<30x128xi32>
    %6 = arith.extui %5 : vector<30x128xi1> to vector<30x128xi32>
    %7 = arith.sitofp %6 : vector<30x128xi32> to vector<30x128xf32>
    %8 = vector.extract_strided_slice %0 {offsets = [1, 0], sizes = [1, 128], strides = [1, 1]} : vector<2x128xi32> to vector<1x128xi32>
    %9 = vector.broadcast %1 : vector<30x1xi32> to vector<30x128xi32>
    %10 = vector.broadcast %8 : vector<1x128xi32> to vector<30x128xi32>
    %11 = arith.cmpi eq, %9, %10 : vector<30x128xi32>
    %12 = arith.extui %11 : vector<30x128xi1> to vector<30x128xi32>
    %13 = arith.sitofp %12 : vector<30x128xi32> to vector<30x128xf32>
    %14 = arith.addf %7, %13 : vector<30x128xf32>
    %c0_1 = arith.constant 0 : index
    %c0_2 = arith.constant 0 : index
    %15 = vector.load %arg3[%c0_1, %c0_2] : memref<33x30xf32, #tpu.memory_space<vmem>>, vector<33x30xf32>
    %cst = arith.constant dense<0.000000e+00> : vector<33x128xf32>
    %16 = tpu.matmul %15, %14, %cst {dimension_numbers = #tpu.dot_dimension_numbers<[1], [0], [0], [1], [0, 0, 1, 1], [], []>} : vector<33x30xf32>, vector<30x128xf32>, vector<33x128xf32> -> vector<33x128xf32>
    %c0_3 = arith.constant 0 : index
    %c0_4 = arith.constant 0 : index
    %17 = vector.load %arg4[%c0_3, %c0_4] : memref<32x64xf32, #tpu.memory_space<vmem>>, vector<32x64xf32>
    %c0_5 = arith.constant 0 : index
    %c0_6 = arith.constant 0 : index
    %18 = vector.load %arg2[%c0_5, %c0_6] : memref<64x128xf32, #tpu.memory_space<vmem>>, vector<64x128xf32>
    %cst_7 = arith.constant dense<0.000000e+00> : vector<32x128xf32>
    %19 = tpu.matmul %17, %18, %cst_7 {dimension_numbers = #tpu.dot_dimension_numbers<[1], [0], [0], [1], [0, 0, 1, 1], [], []>} : vector<32x64xf32>, vector<64x128xf32>, vector<32x128xf32> -> vector<32x128xf32>
    %c0_8 = arith.constant 0 : index
    %c0_9 = arith.constant 0 : index
    %20 = vector.load %arg5[%c0_8, %c0_9] : memref<32x1xf32, #tpu.memory_space<vmem>>, vector<32x1xf32>
    %21 = vector.broadcast %20 : vector<32x1xf32> to vector<32x128xf32>
    %22 = arith.addf %19, %21 : vector<32x128xf32>
    %23 = vector.extract_strided_slice %22 {offsets = [0, 0], sizes = [16, 128], strides = [1, 1]} : vector<32x128xf32> to vector<16x128xf32>
    %24 = vector.extract_strided_slice %22 {offsets = [16, 0], sizes = [16, 128], strides = [1, 1]} : vector<32x128xf32> to vector<16x128xf32>
    %25 = vector.extract_strided_slice %16 {offsets = [0, 0], sizes = [16, 128], strides = [1, 1]} : vector<33x128xf32> to vector<16x128xf32>
    %26 = arith.addf %25, %23 : vector<16x128xf32>
    %27 = arith.addf %26, %24 : vector<16x128xf32>
    %28 = vector.extract_strided_slice %16 {offsets = [16, 0], sizes = [16, 128], strides = [1, 1]} : vector<33x128xf32> to vector<16x128xf32>
    %29 = arith.mulf %23, %23 : vector<16x128xf32>
    %30 = arith.addf %28, %29 : vector<16x128xf32>
    %31 = arith.mulf %24, %24 : vector<16x128xf32>
    %32 = arith.addf %30, %31 : vector<16x128xf32>
    %33 = arith.mulf %27, %27 : vector<16x128xf32>
    %34 = arith.subf %33, %32 : vector<16x128xf32>
    %cst_10 = arith.constant dense<0.000000e+00> : vector<128xf32>
    %35 = vector.multi_reduction <add>, %34, %cst_10 [0] : vector<16x128xf32> to vector<128xf32>
    %36 = vector.shape_cast %35 : vector<128xf32> to vector<1x128xf32>
    %cst_11 = arith.constant 5.000000e-01 : f32
    %37 = vector.broadcast %cst_11 : f32 to vector<1x128xf32>
    %38 = arith.mulf %37, %36 : vector<1x128xf32>
    %39 = vector.extract_strided_slice %16 {offsets = [32, 0], sizes = [1, 128], strides = [1, 1]} : vector<33x128xf32> to vector<1x128xf32>
    %40 = arith.addf %39, %38 : vector<1x128xf32>
    %c0_12 = arith.constant 0 : index
    %c0_13 = arith.constant 0 : index
    %41 = vector.load %arg6[%c0_12, %c0_13] : memref<1x128xf32, #tpu.memory_space<vmem>>, vector<1x128xf32>
    tpu.vector_store %arg6[%c0_12, %c0_13], %40 {strides = array<i32>} : memref<1x128xf32, #tpu.memory_space<vmem>>, vector<1x128xf32>,
    return
  }
  func.func @transform_0(%arg0: i32) -> (i32, i32) {
    %c0_i32 = arith.constant 0 : i32
    %c0_i32_0 = arith.constant 0 : i32
    return %c0_i32, %arg0 : i32, i32
  }
  func.func @transform_1(%arg0: i32) -> (i32, i32) {
    %c0_i32 = arith.constant 0 : i32
    %c0_i32_0 = arith.constant 0 : i32
    return %c0_i32, %arg0 : i32, i32
  }
  func.func @transform_2(%arg0: i32) -> (i32, i32) {
    %c0_i32 = arith.constant 0 : i32
    %c0_i32_0 = arith.constant 0 : i32
    %c0_i32_1 = arith.constant 0 : i32
    return %c0_i32, %c0_i32_0 : i32, i32
  }
  func.func @transform_3(%arg0: i32) -> (i32, i32) {
    %c0_i32 = arith.constant 0 : i32
    %c0_i32_0 = arith.constant 0 : i32
    %c0_i32_1 = arith.constant 0 : i32
    return %c0_i32, %c0_i32_0 : i32, i32
  }
  func.func @transform_4(%arg0: i32) -> (i32, i32) {
    %c0_i32 = arith.constant 0 : i32
    %c0_i32_0 = arith.constant 0 : i32
    %c0_i32_1 = arith.constant 0 : i32
    return %c0_i32, %c0_i32_0 : i32, i32
  }
  func.func @transform_5(%arg0: i32) -> (i32, i32) {
    %c0_i32 = arith.constant 0 : i32
    %c0_i32_0 = arith.constant 0 : i32
    return %c0_i32, %arg0 : i32, i32
  }
}

</mosaic_0001>

<bundles_post_ra>
// kernel: tpu_custom_call.1
= control target key start
LH: loop header
LB: loop body
LE: loop exit
PB: predicated region body
PF: predicated region fallthrough
CT: control target
= control target key end

     0   :  { %10 = vsyncpa [#allocation3], 0  ;;  %s1223_s0 = inlined_call_operand.vmem [shape: s32[2,384], index: 0, kind: input, shape index: {}]   ;;  %s1224_s1 = inlined_call_operand.hbm [shape: f32[64,384], index: 1, kind: input, shape index: {}]   ;;  %s1225_s2 = inlined_call_operand.vmem [shape: f32[33,30], index: 2, kind: input, shape index: {}]   ;;  %s1226_s3 = inlined_call_operand.vmem [shape: f32[32,64], index: 3, kind: input, shape index: {}]   ;;  %s1227_s4 = inlined_call_operand.vmem [shape: f32[32,1], index: 4, kind: input, shape index: {}]   ;;  %s1228_s5 = inlined_call_operand.hbm [shape: f32[1,384], index: 5, kind: output, shape index: {}]  }
   0x1   :  { %12 = vsyncpa [#allocation3 + $0x1], 0 }
   0x2   :  { %13 = vsyncpa [#allocation4], 0 }
   0x3   :  { %15 = vsyncpa [#allocation4 + $0x1], 0  ;;  %s978_s18 = smov 0   ;;  %s980_s19 = smov 0  }
   0x4   :  { %s982_s20 = smov 0   ;;  %s984_s21 = smov 0  }
   0x5 LB: > { %s999_s22 = sadd.s32 4294967295, %s936_s21   ;;  %s666_s23 = sadd.s32 4294967294, %s936_s21   ;;  %s936_s21 = sphi %s984_s21, %s1241_s21   ;;  %s932_s20 = sphi %s982_s20, %s1240_s20   ;;  %s928_s19 = sphi %s980_s19, %s1239_s19   ;;  %s924_s18 = sphi %s978_s18, %s1238_s18  }
   0x6   : > { %s1003_s24 = sadd.s32 1, %s936_s21   ;;  %s54_s25 = sadd.s32 1, %s932_s20 }
   0x7   : > { %s51_s26 = ssub.s32 %s936_s21, %s1003_s24  ;;  %p61_p0 = scmp.ne.s32.totalorder %s932_s20, %s928_s19 }
   0x8   : > { %p52_p1 = scmp.eq.s32.totalorder %s51_s26, 0  ;;  %p62_p2 = scmp.eq.s32.totalorder %s936_s21, 0 }
   0x9   : > { %p67_p3 = scmp.ne.s32.totalorder %s928_s19, %s924_s18  ;;  %p68_p4 = scmp.eq.s32.totalorder %s999_s22, 0 }
   0xa   : > { %s1015_s27 = scalar_select %p52_p1, %s932_s20, %s54_s25  }
   0xb   : > { %p1017_p5 = por %p62_p2, %p61_p0  ;;  %p1021_p6 = por %p68_p4, %p67_p3 }
   0xc   : > { %p154_p7 = scmp.eq.s32.totalorder %s999_s22, 2  ;;  %p160_p8 = scmp.eq.s32.totalorder %s666_s23, 2 }
   0xd   : > { %p796_p9 = scmp.lt.s32.totalorder %s936_s21, 3  ;;  %s196_s7 = sand.u32 1, %s932_s20  }
   0xe   : > { %p1027_p10 = por %p154_p7, %p61_p0  ;;  %p1031_p11 = por %p160_p8, %p67_p3 }
   0xf   : > { %s670_s8 = sshll.u32 %s936_s21, 7  ;;  %s669_s9 = sshll.u32 %s196_s7, 6 }
  0x10   : > { %s1232_s30 = scalar_select %p1027_p10, 1, 0 }
  0x11   : > { %s1233_s6 = scalar_select %p1031_p11, 1, 0 }
  0x12   : > { %s1040_s12 = scalar_lea.hbm %s1224_s1, %s670_s8  ;;  %s200_s13 = scalar_lea.vmem [#allocation2], %s669_s9 }
  0x13   : > { %s206_s14 = sshll.u32 %s200_s13, 4  ;;  %p1044_p12 = pnand %p796_p9, %p1017_p5  ;;  %s1048_s14 = int_to_ptr.vmem [resolvable:$true] %s206_s14 }
  0x14   : > { %s1051_s16 = scalar_lea.sflag [#allocation3], %s196_s7  ;;  %s840_s17 = scalar_lea.hbm %s1040_s12, 1024 }
  0x15   : > { %p841_p0 = scmp.ne.s32.totalorder %s1040_s12, %s840_s17  ;;  %p842_p1 = pneg %p1044_p12 }
  0x16   : > { %s845_s26 = scalar_lea.hbm %s1224_s1, 3072  ;;  %p846_p4 = scmp.lt.u32.totalorder %s1040_s12, %s1224_s1 }
  0x17   : > { %p843_p2 = pnand %p842_p1, %p841_p0  ;;  %p847_p5 = scmp.lt.u32.totalorder %s845_s26, %s840_s17 }
  0x18   : > { %p849_p8 = scmp.lt.u32.totalorder %s840_s17, %s1040_s12 }
  0x19   : > { %p844_p3 = pneg %p843_p2  ;;  %p848_p7 = por %p847_p5, %p846_p4 }
  0x1b   : > { %p850_p9 = por %p849_p8, %p848_p7 }
  0x1d   : > { %p851_p13 = pnand %p850_p9, %p844_p3 }
  0x1f   : > { %854 = shalt.err (!%p851_p13)
}
  0x20   : > { %s855_s7 = scalar_lea.vmem %s1048_s14, 1024  ;;  %s938_s9 = smov [#allocation2]  }
  0x21   : > { %p856_p0 = scmp.ne.s32.totalorder %s1048_s14, %s855_s7  ;;  %s860_s10 = sshll.u32 %s938_s9, 4  ;;  %s861_s10 = int_to_ptr.vmem [resolvable:$false] %s860_s10 }
  0x22   : > { %s862_s11 = scalar_lea.vmem %s861_s10, 2048  ;;  %p863_p10 = scmp.lt.s32.totalorder %s1048_s14, %s861_s10 }
  0x23   : > { %p858_p2 = pnand %p856_p0, %p842_p1  ;;  %p864_p4 = scmp.lt.s32.totalorder %s862_s11, %s855_s7 }
  0x25   : > { %p859_p11 = pneg %p858_p2  ;;  %p865_p5 = por %p864_p4, %p863_p10 }
  0x27   : > { %p866_p7 = pnand %p865_p5, %p859_p11 }
  0x29   : > { %869 = shalt.err (!%p866_p7)
}
  0x2a   : > { %s939_s13 = smov 384   ;;  %s940_s17 = smov 128  }
  0x2b   : > { %s941_s23 = smov 8   ;;  %p214_p13 = scmp.lt.s32.totalorder %s936_s21, 4 }
  0x2c   : > { %791 = dma.hbm_to_vmem [thread:$0]  (!%p1044_p12), %s1040_s12, 1024, %s1048_s14, %s1051_s16, %s939_s13, %s940_s17, %s941_s23  }
  0x2d   : > { %p1235_p1 = scmp.ge.s32.totalorder %s936_s21, 1 }
  0x2f   : > { %p215_p3 = pnand %p1235_p1, %p214_p13 }
  0x30   : > { %s1083_s25 = sand.u32 (!%p215_p3), 1, %s928_s19  }
  0x31   : > { %218 = sbr.rel (%p215_p3) target bundleno = 341 (0x155), region = 40  ;;  %s672_s26 = sshll.u32 (!%p215_p3), %s1083_s25, 6 }
  0x32   : > { %s221_s28 = scalar_lea.sflag (!%p215_p3), [#allocation3], %s1083_s25  ;;  %s1087_s8 = scalar_lea.vmem (!%p215_p3), [#allocation2], %s672_s26 }
  0x38   : > { %915 = dma.done.wait (%p1021_p6), %s221_s28, 1024  }
  0x39   : > { %917 = vsyncadd (%p1021_p6), %s221_s28, 4294966272  ;;  %p254_p10 = scmp.lt.s32.totalorder %s999_s22, 2  ;;  %v259_v0 = vlaneseq  ;;  %v942_v1 = vmov 0.0|0.0   ;;  %vm943_vm0 = vmmov 0   ;;  %v944_v3 = vmov 0.0   ;;  %v419_v7 = vld [vmem:[%s1087_s8] sm:$0xff] }
  0x3a   : > { %761 = vmatprep.subr.bf16.mxu0 %v942_v1  ;;  %724 = vmatprep.mubr.msk.f32.mxu0 %vm943_vm0, %v944_v3  ;;  %v945_v4 = vmov 0   ;;  %v420_v8 = vld [vmem:[%s1087_s8 + $0x8] sm:$0xff]  ;;  %v421_v9 = vld [vmem:[%s1087_s8 + $0x10] sm:$0xff]  ;;  %v422_v12 = vld [vmem:[%s1087_s8 + $0x18] sm:$0xff]  ;;  %vm451_vm1 = vcmask 523264   ;;  %vm321_vm2 = vcmask 1045504  }
  0x3b   : > { %s255_s12 = scalar_select %p254_p10, %s999_s22, 2  ;;  %v260_v2 = vshrl.u32 %v259_v0, 7  ;;  %838 = vset.pattern.permute.xlu0 %v945_v4  ;;  %839 = vset.pattern.permute.xlu1 %v945_v4  ;;  %v768_v11 = vpack.c.bf16 %v420_v8, %v419_v7  ;;  %v423_v14 = vld [vmem:[%s1087_s8 + $0x20] sm:$0xff]  ;;  %v772_v16 = vpack.c.bf16 %v422_v12, %v421_v9  ;;  %v424_v19 = vld [vmem:[%s1087_s8 + $0x28] sm:$0xff]  ;;  %v425_v27 = vld [vmem:[%s1087_s8 + $0x30] sm:$0xff]  ;;  %vm946_vm11 = vmmov 1  }
  0x3c   : > { %v776_v21 = vpack.c.bf16 %v424_v19, %v423_v14  ;;  %v415_v22 = vld [vmem:[%s1226_s3] sm:$0xff]  ;;  %v426_v30 = vld [vmem:[%s1087_s8 + $0x38] sm:$0xff]  ;;  %v429_v32 = vld [vmem:[%s1227_s4 + $0x10] sm:$0xff]  ;;  %vm305_vm13 = vcmask 244736   ;;  %s253_s14 = scalar_lea.vmem [#allocation5], %s1083_s25  ;;  %s576_s10 = scalar_lea.sflag [#allocation4], %s1083_s25 }
  0x3d   : > { %s673_s29 = sshll.u32 %s255_s12, 1  ;;  %v266_v5 = vsub.s32 0, %v260_v2  ;;  %v282_v6 = vsub.s32 1, %v260_v2  ;;  %v261_v10 = vadd.s32 8, %v260_v2  ;;  %v262_v15 = vadd.s32 16, %v260_v2  ;;  %769 = vmatprep.subr.bf16.mxu1 %v768_v11  ;;  %755 = vmatprep.mubr.msk.f32.mxu1 %vm451_vm1, %v415_v22  ;;  %v427_v31 = vld [vmem:[%s1227_s4] sm:$0xff]  ;;  %vm766_vm12 = vmpackc.low %vm321_vm2, %vm946_vm11 }
  0x3e   : > { %s257_s16 = scalar_lea.vmem %s1223_s0, %s673_s29  ;;  %v263_v20 = vadd.s32 24, %v260_v2  ;;  %771 = vmatpush3.bf16.msra.mxu1 %v768_v11  ;;  %433 = vperm.xlu0 %838, %v427_v31   ;;  %v428_v38 = vld [vmem:[%s1227_s4 + $0x8] sm:$0xff]  ;;  %v780_v41 = vpack.c.bf16 %v426_v30, %v425_v27  ;;  %v430_v42 = vld [vmem:[%s1227_s4 + $0x18] sm:$0xff]  ;;  %v300_v44 = vld [vmem:[%s1225_s2] sm:$0xff]  ;;  %s692_s29 = sshll.u32 %s999_s22, 4 }
  0x3f   : > { %v258_v13 = vld [vmem:[%s257_s16] sm:$0x3]  ;;  %773 = vmatprep.subr.bf16.mxu1 %v772_v16  ;;  %443 = vperm.xlu1 %839, %v429_v32   ;;  %v416_v45 = vld [vmem:[%s1226_s3 + $0x8] sm:$0xff]  ;;  %v417_v46 = vld [vmem:[%s1226_s3 + $0x10] sm:$0xff]  ;;  %s588_s15 = sshll.u32 %s253_s14, 4  ;;  %s1180_s9 = scalar_lea.hbm %s1228_s5, %s692_s29  ;;  %s1182_s15 = int_to_ptr.vmem [resolvable:$true] %s588_s15 }
  0x40   : > { %v267_v17 = vrot.slane %v258_v13, %v266_v5  ;;  %v283_v18 = vrot.slane %v258_v13, %v282_v6  ;;  %v301_v47 = vld [vmem:[%s1225_s2 + $0x8] sm:$0xff]  ;;  %v418_v48 = vld [vmem:[%s1226_s3 + $0x18] sm:$0xff]  ;;  %v302_v49 = vld [vmem:[%s1225_s2 + $0x10] sm:$0xff]  ;;  %s870_s11 = scalar_lea.vmem %s1182_s15, 16  ;;  %p1236_p11 = scmp.ne.s32.totalorder %s1232_s30, 0 }
  0x41   : > { %v303_v50 = vld [vmem:[%s1225_s2 + $0x18] sm:$0xff]  ;;  %v304_v51 = vld [vmem:[%s1225_s2 + $0x20] sm:$0x1]  ;;  %p871_p6 = scmp.ne.s32.totalorder %s1182_s15, %s870_s11  ;;  %s947_s22 = smov [#allocation5]  }
  0x42   : > { %vm268_vm3 = vcmp.eq.s32.totalorder %v260_v2, %v267_v17  ;;  %vm269_vm4 = vcmp.eq.s32.totalorder %v261_v10, %v267_v17  ;;  %vm284_vm5 = vcmp.eq.s32.totalorder %v260_v2, %v283_v18  ;;  %vm285_vm6 = vcmp.eq.s32.totalorder %v261_v10, %v283_v18  ;;  %775 = vmatpush3.bf16.msra.mxu1 %v772_v16  ;;  %s874_s13 = sshll.u32 %s947_s22, 4  ;;  %s875_s13 = int_to_ptr.vmem [resolvable:$false] %s874_s13 }
  0x43   : > { %v674_v23 = vsel %vm268_vm3, 1.0, %v944_v3  ;;  %v675_v24 = vsel %vm269_vm4, 1.0, %v944_v3  ;;  %v678_v25 = vsel %vm284_vm5, 1.0, %v944_v3  ;;  %v679_v26 = vsel %vm285_vm6, 1.0, %v944_v3  ;;  %777 = vmatprep.subr.bf16.mxu1 %v776_v21  ;;  %438 = vperm.xlu0 %838, %v428_v38   ;;  %p872_p12 = pnand %p871_p6, %p1236_p11  ;;  %s876_s17 = scalar_lea.vmem %s875_s13, 32 }
  0x44   : > { %v296_v28 = vadd.f32 %v678_v25, %v674_v23  ;;  %v297_v29 = vadd.f32 %v679_v26, %v675_v24  ;;  %vm270_vm7 = vcmp.eq.s32.totalorder %v262_v15, %v267_v17  ;;  %vm271_vm8 = vcmp.eq.s32.totalorder %v263_v20, %v267_v17  ;;  %448 = vperm.xlu1 %839, %v430_v42   ;;  %p877_p9 = scmp.lt.s32.totalorder %s1182_s15, %s875_s13  ;;  %p878_p0 = scmp.lt.s32.totalorder %s876_s17, %s870_s11 }
  0x45   : > { %v676_v33 = vsel %vm270_vm7, 1.0, %v944_v3  ;;  %v677_v34 = vsel %vm271_vm8, 1.0, %v944_v3  ;;  %vm286_vm9 = vcmp.eq.s32.totalorder %v262_v15, %v283_v18  ;;  %vm287_vm10 = vcmp.eq.s32.totalorder %v263_v20, %v283_v18  ;;  %p873_p8 = pneg %p872_p12 }
  0x46   : > { %v762_v35 = vpack.c.bf16 %v297_v29, %v296_v28  ;;  %v680_v36 = vsel %vm286_vm9, 1.0, %v944_v3  ;;  %v681_v37 = vsel %vm287_vm10, 1.0, %v944_v3  ;;  %779 = vmatpush3.bf16.msra.mxu1 %v776_v21  ;;  %p879_p2 = por %p878_p0, %p877_p9 }
  0x47   : > { %v298_v39 = vadd.f32 %v680_v36, %v676_v33  ;;  %v299_v40 = vadd.f32 %v681_v37, %v677_v34  ;;  %781 = vmatprep.subr.bf16.mxu1 %v780_v41 }
  0x48   : > { %763 = vmatpush3.bf16.msra.mxu0 %v762_v35  ;;  %p880_p4 = pnand %p879_p2, %p873_p8 }
  0x49   : > { %764 = vmatprep.subr.bf16.mxu0 %v942_v1  ;;  %v765_v43 = vpack.c.bf16 %v299_v40, %v298_v39 }
  0x4a   : > { %783 = vmatpush3.bf16.msra.mxu1 %v780_v41 }
  0x4c   : > { %767 = vmatpush3.bf16.msk.msra.mxu0 %vm766_vm12, %v765_v43 }
  0x4d   : > { %756 = vmatmul.mubr.msk.f32.vlgmr.msra.gmra.mrb[0].mxu1 %vm451_vm1, %v416_v45 }
  0x4e   : > { %758 = vmatprep.mubr.msk.f32.mxu1 %vm451_vm1, %v417_v46 }
  0x4f   : > { %725 = vmatmul.mubr.msk.f32.vlgmr.msra.gmra.mrb[0].mxu0 %vm305_vm13, %v300_v44 }
  0x50   : > { %727 = vmatprep.mubr.msk.f32.mxu0 %vm943_vm0, %v944_v3 }
  0x51   : > { %759 = vmatmul.mubr.msk.f32.gmra.mrb[2].mxu1 %vm451_vm1, %v418_v48 }
  0x53   : > { %728 = vmatmul.mubr.msk.f32.gmra.mrb[2].mxu0 %vm305_vm13, %v301_v47 }
  0x54   : > { %730 = vmatprep.mubr.msk.f32.mxu0 %vm943_vm0, %v944_v3 }
  0x57   : > { %731 = vmatmul.mubr.msk.f32.gmra.mrb[4].mxu0 %vm305_vm13, %v302_v49 }
  0x58   : > { %733 = vmatprep.mubr.msk.f32.mxu0 %vm943_vm0, %v944_v3 }
  0x5b   : > { %734 = vmatmul.mubr.msk.f32.gmra.mrb[6].mxu0 %vm305_vm13, %v303_v50 }
  0x5c   : > { %736 = vmatprep.mubr.msk.f32.mxu0 %vm943_vm0, %v944_v3 }
  0x5f   : > { %737 = vmatmul.mubr.msk.f32.gmra.mrb[8].mxu0 %vm305_vm13, %v304_v51 }
  0xbd   : > { %v434_v52 = vpop.permute.xlu0 %433 }
  0xbe   : > { %v444_v53 = vpop.permute.xlu1 %443 }
  0xc2   : > { %v439_v55 = vpop.permute.xlu0 %438 }
  0xc3   : > { %v449_v62 = vpop.permute.xlu1 %448 }
 0x120   : > { %v757_v57 = vpop.f32.mrb[0].mxu1 }
 0x121   : > { %v536_v58 = vadd.f32 %v757_v57, %v439_v55  ;;  %v530_v59 = vpop.f32.mrb[1].mxu1 }
 0x122   : > { %v391_v54 = vpop.f32.mrb[0].mxu0  ;;  %v531_v61 = vadd.f32 %v530_v59, %v434_v52 }
 0x123   : > { %v726_v56 = vpop.f32.mrb[1].mxu0  ;;  %v554_v13 = vmul.f32 %v536_v58, %v536_v58 }
 0x124   : > { %v549_v1 = vadd.f32 %v531_v61, %v391_v54  ;;  %v760_v2 = vpop.f32.mrb[2].mxu1  ;;  %v553_v3 = vmul.f32 %v531_v61, %v531_v61 }
 0x125   : > { %v546_v4 = vadd.f32 %v760_v2, %v449_v62  ;;  %v540_v5 = vpop.f32.mrb[3].mxu1 }
 0x126   : > { %v396_v60 = vpop.f32.mrb[2].mxu0  ;;  %v541_v7 = vadd.f32 %v540_v5, %v444_v53 }
 0x127   : > { %v550_v63 = vadd.f32 %v536_v58, %v396_v60  ;;  %v729_v0 = vpop.f32.mrb[3].mxu0  ;;  %v558_v17 = vmul.f32 %v546_v4, %v546_v4 }
 0x128   : > { %v551_v11 = vadd.f32 %v549_v1, %v541_v7  ;;  %v557_v12 = vmul.f32 %v541_v7, %v541_v7 }
 0x129   : > { %v552_v8 = vadd.f32 %v550_v63, %v546_v4 }
 0x12a   : > { %v401_v6 = vpop.f32.mrb[4].mxu0  ;;  %v561_v15 = vmul.f32 %v551_v11, %v551_v11 }
 0x12b   : > { %v555_v9 = vadd.f32 %v553_v3, %v401_v6  ;;  %v732_v10 = vpop.f32.mrb[5].mxu0  ;;  %v562_v21 = vmul.f32 %v552_v8, %v552_v8 }
 0x12d   : > { %v559_v14 = vadd.f32 %v557_v12, %v555_v9 }
 0x12e   : > { %v406_v16 = vpop.f32.mrb[6].mxu0 }
 0x12f   : > { %v556_v18 = vadd.f32 %v554_v13, %v406_v16  ;;  %v735_v19 = vpop.f32.mrb[7].mxu0  ;;  %v563_v20 = vsub.f32 %v561_v15, %v559_v14 }
 0x131   : > { %v560_v22 = vadd.f32 %v558_v17, %v556_v18 }
 0x132   : > { %v411_v23 = vpop.f32.mrb[8].mxu0 }
 0x133   : > { %v564_v24 = vsub.f32 %v562_v21, %v560_v22  ;;  %v738_v25 = vpop.f32.mrb[9].mxu0 }
 0x135   : > { %v565_v26 = vadd.f32 %v564_v24, %v563_v20 }
 0x137   : > { %v566_v27 = vrot.slane %v565_v26, 4 }
 0x139   : > { %v567_v28 = vadd.f32 %v566_v27, %v565_v26 }
 0x13b   : > { %v568_v29 = vrot.slane %v567_v28, 2 }
 0x13d   : > { %v569_v30 = vadd.f32 %v568_v29, %v567_v28 }
 0x13f   : > { %v570_v31 = vrot.slane %v569_v30, 1 }
 0x141   : > { %v571_v32 = vadd.f32 %v570_v31, %v569_v30 }
 0x143   : > { %v572_v33 = vmul.f32 0.5, %v571_v32 }
 0x145   : > { %v573_v34 = vadd.f32 %v572_v33, %v411_v23 }
 0x147   : > { %574 = vst [vmem:[%s253_s14] sm:$0x1] %v573_v34 }
 0x148   : > { %883 = shalt.err (!%p880_p4)
}
 0x149   : > { %s884_s25 = scalar_lea.hbm %s1180_s9, 16  ;;  %s888_s28 = scalar_lea.hbm %s1228_s5, 48 }
 0x14a   : > { %p885_p5 = scmp.ne.s32.totalorder %s1180_s9, %s884_s25  ;;  %p889_p1 = scmp.lt.u32.totalorder %s1180_s9, %s1228_s5 }
 0x14b   : > { %p890_p3 = scmp.lt.u32.totalorder %s888_s28, %s884_s25  ;;  %p892_p6 = scmp.lt.u32.totalorder %s884_s25, %s1180_s9 }
 0x14c   : > { %p886_p7 = pnand %p885_p5, %p1236_p11 }
 0x14d   : > { %p891_p10 = por %p890_p3, %p889_p1 }
 0x14e   : > { %p887_p13 = pneg %p886_p7 }
 0x14f   : > { %p893_p12 = por %p892_p6, %p891_p10 }
 0x151   : > { %p894_p8 = pnand %p893_p12, %p887_p13 }
 0x153   : > { %897 = shalt.err (!%p894_p8)
}
 0x154   : > { %786 = dma.vmem_to_hbm [thread:$0]  (%p1236_p11), %s1182_s15, 16, %s1180_s9, %s576_s10  }
 0x155 PF: > { %p797_p9 = scmp.ge.s32.totalorder %s936_s21, 2  ;;  %s600_s29 = sand.u32 1, %s924_s18  }
 0x156   : > { %p1237_p0 = scmp.ne.s32.totalorder %s1233_s6, 0  ;;  %s601_s14 = scalar_lea.sflag [#allocation4], %s600_s29 }
 0x158   : > { %p793_p2 = pnand %p797_p9, %p1237_p0 }
 0x15a   : > { %919 = dma.done.wait (!%p793_p2), %s601_s14, 16  }
 0x15b   : > { %921 = vsyncadd (!%p793_p2), %s601_s14, 4294967280  ;;  %p18_p4 = scmp.ge.s32.totalorder %s1003_s24, 5   ;;  %s1238_s18 = smov %s928_s19 }
 0x15c   : > { %s1239_s19 = smov %s932_s20  ;;  %s1240_s20 = smov %s1015_s27 }
 0x15d   : > { %s1241_s21 = smov %s1003_s24  ;;  %20 = sbr.rel (!%p18_p4) target bundleno = 5 (0x5), region = 88 }
 0x164   :  { %605 = vsyncpa [#allocation3], 1 }
 0x165   :  { %607 = vsyncpa [#allocation3 + $0x1], 1 }
 0x166   :  { %608 = vsyncpa [#allocation4], 1 }
 0x167   :  { %610 = vsyncpa [#allocation4 + $0x1], 1 }

</bundles_post_ra>
